<compile_context>
chip_gen: v7x
topology: tpu7x:2x2x1
jax: 0.10.0
libtpu: 0.0.40
codegen_flags: <defaults>
</compile_context>

<pallas_src>
import functools

import jax
import jax.numpy as jnp
from jax.experimental import pallas as pl
from jax.experimental.pallas import tpu as pltpu

_LANES = 128
_ROW_ALIGN = 16            # sublane alignment covering both f32 (8) and bf16 (16)
_SMALL_N = 1 << 20         # below this a fused XLA reduction beats a pallas_call
_MIB = 1024 * 1024


def _chip_kind() -> str:
    try:
        return jax.devices()[0].device_kind.lower()
    except Exception:  # pragma: no cover - defensive only
        return ""


def _chip_config():
    """(num_slabs, block_bytes_per_input, vmem_limit_bytes) per TPU generation."""
    kind = _chip_kind()
    if "v7" in kind:
        # v7x: 2 TensorCores but only 64 MiB VMEM/TC -> 4 MiB blocks, modest limit.
        return 2, 4 * _MIB, 40 * _MIB
    if "v5" in kind or "v6" in kind:
        # v5e/v6e: single TC, 128 MiB VMEM -> amortize step overhead further.
        return 1, 8 * _MIB, 72 * _MIB
    # Unknown chip: conservative settings that fit every generation.
    return 1, 4 * _MIB, 40 * _MIB


def _mse_ref(predict, target):
    d = predict.astype(jnp.float32) - target.astype(jnp.float32)
    return jnp.mean(d * d)


def _mse_partial_kernel(p_ref, t_ref, out_ref, *, block_rows, inner, rows, two_d):
    if two_d:
        c = pl.program_id(0)          # "parallel": partial-sum slab (v7x TensorCore)
        i = pl.program_id(1)          # "arbitrary": reduction over row blocks
    else:
        c = 0
        i = pl.program_id(0)

    @pl.when(i == 0)
    def _():
        out_ref[...] = jnp.zeros_like(out_ref)

    b = c * inner + i
    row0 = b * block_rows
    n_valid = rows - row0             # >=block_rows: full; (0,block_rows): ragged; <=0: phantom

    def _sq():
        d = p_ref[...].astype(jnp.float32) - t_ref[...].astype(jnp.float32)
        return d * d

    # Common path: full block, no masking at all (pure VPU fold onto (8,128) slab).
    @pl.when(n_valid >= block_rows)
    def _():
        sq = _sq()
        out_ref[...] += sq.reshape(block_rows // 8, 8, _LANES).sum(axis=0)

    # Single ragged (last) block: row mask via select (NOT multiply, so stale
    # NaN/Inf rows cannot propagate).
    @pl.when(jnp.logical_and(n_valid > 0, n_valid < block_rows))
    def _():
        sq = _sq()
        rid = jax.lax.broadcasted_iota(jnp.int32, sq.shape, 0)
        sq = jnp.where(rid < n_valid, sq, 0.0)
        out_ref[...] += sq.reshape(block_rows // 8, 8, _LANES).sum(axis=0)

    # n_valid <= 0: phantom block on an odd 2-slab split -> contributes nothing.


def content_loss(predict, target, *, min_kernel_elems=_SMALL_N, block_bytes=None,
                 num_slabs=None):
    """MSE(predict, target), mean reduction. Returns (predict, loss), mirroring
    ContentLoss.forward (input passed through, loss stashed alongside)."""
    assert predict.shape == target.shape, "predict/target shapes must match"
    n = predict.size
    if n == 0:                        # F.mse_loss on an empty input is NaN (0/0)
        return predict, jnp.float32(float("nan"))

    rows = n // _LANES
    use_kernel = (
        n >= min_kernel_elems
        and n % _LANES == 0           # free bitcast reshape to (rows, 128); no pad copy
        and rows >= _ROW_ALIGN
        and predict.dtype == target.dtype
    )
    if not use_kernel:
        # Small or ragged-to-128 inputs: fused XLA reduction is faster than the
        # pallas_call fixed cost and needs no padding / partials round-trip.
        return predict, _mse_ref(predict, target)

    slabs_cfg, budget_cfg, vmem_limit = _chip_config()
    ncores = int(num_slabs) if num_slabs is not None else slabs_cfg
    budget = int(block_bytes) if block_bytes is not None else budget_cfg

    itemsize = predict.dtype.itemsize
    budget_rows = max(_ROW_ALIGN, budget // (_LANES * itemsize))   # dtype-aware budget

    p2d = predict.reshape(rows, _LANES)   # free bitcast views, native dtype in HBM
    t2d = target.reshape(rows, _LANES)

    rows_aligned = rows - rows % _ROW_ALIGN            # >= _ROW_ALIGN by the guard above
    nb = max(ncores, pl.cdiv(rows, budget_rows))
    if ncores == 2 and nb % 2:
        nb += 1                                         # even 2-slab split where possible
    block_rows = pl.cdiv(rows, nb)
    block_rows = pl.cdiv(block_rows, _ROW_ALIGN) * _ROW_ALIGN
    block_rows = min(block_rows, rows_aligned)          # block never exceeds the array
    nb = pl.cdiv(rows, block_rows)                      # actual block count
    inner = pl.cdiv(nb, ncores)
    last_block = nb - 1

    two_d = ncores > 1
    kernel = functools.partial(
        _mse_partial_kernel,
        block_rows=block_rows, inner=inner, rows=rows, two_d=two_d)

    if two_d:
        grid = (ncores, inner)
        # Clamp so any phantom block (odd split) never DMAs out of bounds; its
        # compute/accumulate is skipped in-kernel.
        in_map = lambda c, i: (jnp.minimum(c * inner + i, last_block), 0)
        out_map = lambda c, i: (c, 0)
        semantics = ("parallel", "arbitrary")
    else:
        grid = (inner,)
        in_map = lambda i: (jnp.minimum(i, last_block), 0)
        out_map = lambda i: (0, 0)
        semantics = ("arbitrary",)

    out_bytes = ncores * 8 * _LANES * 4
    cost = pl.CostEstimate(
        flops=3 * n,                                     # sub + mul + accumulate
        transcendentals=0,
        bytes_accessed=2 * n * itemsize + out_bytes)     # pure HBM-bound streaming

    partials = pl.pallas_call(
        kernel,
        out_shape=jax.ShapeDtypeStruct((ncores * 8, _LANES), jnp.float32),
        grid=grid,
        in_specs=[
            pl.BlockSpec((block_rows, _LANES), in_map),
            pl.BlockSpec((block_rows, _LANES), in_map),
        ],
        out_specs=pl.BlockSpec((8, _LANES), out_map),
        compiler_params=pltpu.CompilerParams(
            dimension_semantics=semantics,
            vmem_limit_bytes=vmem_limit),
        cost_estimate=cost,
    )(p2d, t2d)

    # Single tiny cross-lane reduce + mean scale outside the kernel.
    loss = jnp.sum(partials) / jnp.float32(n)
    return predict, loss


class ContentLoss:
    """Mirrors the PyTorch module: __call__ returns `predict` unchanged and
    stores the MSE against the frozen target in `self.loss`."""

    def __init__(self, target):
        self.target = jax.lax.stop_gradient(target)
        self.loss = None

    def __call__(self, predict):
        predict, self.loss = content_loss(predict, self.target)
        return predict


if __name__ == "__main__":
    key = jax.random.PRNGKey(0)
    k1, k2, k3, k4 = jax.random.split(key, 4)

    # Small NCHW feature maps, as the module is used in style transfer.
    shape = (2, 4, 16, 16)
    predict = jax.random.normal(k1, shape, dtype=jnp.float32)
    target = jax.random.normal(k2, shape, dtype=jnp.float32)

    # Module-style usage (small input -> fused-XLA fast path).
    content = ContentLoss(target)
    out = content(predict)
    jax.block_until_ready((out, content.loss))
    ref = _mse_ref(predict, target)
    assert jnp.allclose(content.loss, ref, rtol=1e-5, atol=1e-6), (content.loss, ref)
    assert jnp.array_equal(out, predict)

    # Force the Pallas kernel path on the same small input (single full block).
    _, loss_k = content_loss(predict, target, min_kernel_elems=0)
    jax.block_until_ready(loss_k)
    assert jnp.allclose(loss_k, ref, rtol=1e-5, atol=1e-6), (loss_k, ref)

    # Multi-block grid with a ragged last block (row mask confined to one block).
    shape2 = (2, 4, 32, 40)                       # 10240 elements -> 80 rows of 128
    p2 = jax.random.normal(k3, shape2, dtype=jnp.float32)
    t2 = jax.random.normal(k4, shape2, dtype=jnp.float32)
    _, loss2 = content_loss(p2, t2, min_kernel_elems=0,
                            block_bytes=32 * _LANES * 4)      # 32-row blocks
    ref2 = _mse_ref(p2, t2)
    jax.block_until_ready(loss2)
    assert jnp.allclose(loss2, ref2, rtol=1e-5, atol=1e-6), (loss2, ref2)

    # Two partial-sum slabs (v7x-style split), including the phantom-block skip.
    _, loss3 = content_loss(p2, t2, min_kernel_elems=0, num_slabs=2,
                            block_bytes=16 * _LANES * 4)      # 16-row blocks
    jax.block_until_ready(loss3)
    assert jnp.allclose(loss3, ref2, rtol=1e-5, atol=1e-6), (loss3, ref2)

    # Native bf16 inputs: halves HBM traffic; the cast to f32 happens in-kernel only.
    pb = predict.astype(jnp.bfloat16)
    tb = target.astype(jnp.bfloat16)
    _, loss4 = content_loss(pb, tb, min_kernel_elems=0)
    ref4 = _mse_ref(pb, tb)
    jax.block_until_ready(loss4)
    assert jnp.allclose(loss4, ref4, rtol=1e-3, atol=1e-3), (loss4, ref4)

    print("KERNEL_OK")
</pallas_src>

<mosaic_0001>
module attributes {stable_mosaic.version = 11 : i64} {
  func.func @_mse_partial_kernel(%arg0: i32, %arg1: memref<16x128xf32, #tpu.memory_space<vmem>>, %arg2: memref<16x128xf32, #tpu.memory_space<vmem>>, %arg3: memref<8x128xf32, #tpu.memory_space<vmem>>) attributes {dimension_semantics = [#tpu.dimension_semantics<arbitrary>], iteration_bounds = array<i64: 1>, scalar_prefetch = 0 : i64, scratch_operands = 0 : i64, tpu.core_type = #tpu.core_type<tc>, window_params = [{transform_indices = @transform_0, window_bounds = array<i64: 16, 128>}, {transform_indices = @transform_1, window_bounds = array<i64: 16, 128>}, {pipeline_mode = #tpu.pipeline_mode<synchronous>, transform_indices = @transform_2, window_bounds = array<i64: 8, 128>}]} {
    %c0_i32 = arith.constant 0 : i32
    %0 = arith.cmpi eq, %arg0, %c0_i32 : i32
    %1 = arith.extui %0 : i1 to i32
    %c0_i32_0 = arith.constant 0 : i32
    %2 = arith.cmpi ne, %1, %c0_i32_0 : i32
    scf.if %2 {
      %cst = arith.constant 0.000000e+00 : f32
      %14 = vector.broadcast %cst : f32 to vector<8x128xf32>
      %c0 = arith.constant 0 : index
      %c0_8 = arith.constant 0 : index
      %15 = vector.load %arg3[%c0, %c0_8] : memref<8x128xf32, #tpu.memory_space<vmem>>, vector<8x128xf32>
      tpu.vector_store %arg3[%c0, %c0_8], %14 {strides = array<i32>} : memref<8x128xf32, #tpu.memory_space<vmem>>, vector<8x128xf32>,
    } else {
    }
    %c0_i32_1 = arith.constant 0 : i32
    %3 = arith.addi %c0_i32_1, %arg0 : i32
    %c16_i32 = arith.constant 16 : i32
    %4 = arith.muli %3, %c16_i32 : i32
    %c16_i32_2 = arith.constant 16 : i32
    %5 = arith.subi %c16_i32_2, %4 : i32
    %c16_i32_3 = arith.constant 16 : i32
    %6 = arith.cmpi sge, %5, %c16_i32_3 : i32
    %7 = arith.extui %6 : i1 to i32
    %c0_i32_4 = arith.constant 0 : i32
    %8 = arith.cmpi ne, %7, %c0_i32_4 : i32
    scf.if %8 {
      %c0 = arith.constant 0 : index
      %c0_8 = arith.constant 0 : index
      %14 = vector.load %arg1[%c0, %c0_8] : memref<16x128xf32, #tpu.memory_space<vmem>>, vector<16x128xf32>
      %c0_9 = arith.constant 0 : index
      %c0_10 = arith.constant 0 : index
      %15 = vector.load %arg2[%c0_9, %c0_10] : memref<16x128xf32, #tpu.memory_space<vmem>>, vector<16x128xf32>
      %16 = arith.subf %14, %15 : vector<16x128xf32>
      %17 = arith.mulf %16, %16 : vector<16x128xf32>
      %c0_11 = arith.constant 0 : index
      %c0_12 = arith.constant 0 : index
      %18 = vector.load %arg3[%c0_11, %c0_12] : memref<8x128xf32, #tpu.memory_space<vmem>>, vector<8x128xf32>
      %19 = vector.shape_cast %17 : vector<16x128xf32> to vector<2x8x128xf32>
      %cst = arith.constant dense<0.000000e+00> : vector<8x128xf32>
      %20 = vector.multi_reduction <add>, %19, %cst [0] : vector<2x8x128xf32> to vector<8x128xf32>
      %21 = arith.addf %18, %20 : vector<8x128xf32>
      %c0_13 = arith.constant 0 : index
      %c0_14 = arith.constant 0 : index
      %22 = vector.load %arg3[%c0_13, %c0_14] : memref<8x128xf32, #tpu.memory_space<vmem>>, vector<8x128xf32>
      tpu.vector_store %arg3[%c0_13, %c0_14], %21 {strides = array<i32>} : memref<8x128xf32, #tpu.memory_space<vmem>>, vector<8x128xf32>,
    } else {
    }
    %c0_i32_5 = arith.constant 0 : i32
    %9 = arith.cmpi sgt, %5, %c0_i32_5 : i32
    %c16_i32_6 = arith.constant 16 : i32
    %10 = arith.cmpi slt, %5, %c16_i32_6 : i32
    %11 = arith.andi %9, %10 : i1
    %12 = arith.extui %11 : i1 to i32
    %c0_i32_7 = arith.constant 0 : i32
    %13 = arith.cmpi ne, %12, %c0_i32_7 : i32
    scf.if %13 {
      %c0 = arith.constant 0 : index
      %c0_8 = arith.constant 0 : index
      %14 = vector.load %arg1[%c0, %c0_8] : memref<16x128xf32, #tpu.memory_space<vmem>>, vector<16x128xf32>
      %c0_9 = arith.constant 0 : index
      %c0_10 = arith.constant 0 : index
      %15 = vector.load %arg2[%c0_9, %c0_10] : memref<16x128xf32, #tpu.memory_space<vmem>>, vector<16x128xf32>
      %16 = arith.subf %14, %15 : vector<16x128xf32>
      %17 = arith.mulf %16, %16 : vector<16x128xf32>
      %18 = tpu.iota {dimensions = array<i32: 0>} : vector<16x128xi32>
      %19 = vector.broadcast %5 : i32 to vector<16x128xi32>
      %20 = arith.cmpi slt, %18, %19 : vector<16x128xi32>
      %cst = arith.constant 0.000000e+00 : f32
      %21 = vector.broadcast %cst : f32 to vector<16x128xf32>
      %22 = arith.select %20, %17, %21 : vector<16x128xi1>, vector<16x128xf32>
      %c0_11 = arith.constant 0 : index
      %c0_12 = arith.constant 0 : index
      %23 = vector.load %arg3[%c0_11, %c0_12] : memref<8x128xf32, #tpu.memory_space<vmem>>, vector<8x128xf32>
      %24 = vector.shape_cast %22 : vector<16x128xf32> to vector<2x8x128xf32>
      %cst_13 = arith.constant dense<0.000000e+00> : vector<8x128xf32>
      %25 = vector.multi_reduction <add>, %24, %cst_13 [0] : vector<2x8x128xf32> to vector<8x128xf32>
      %26 = arith.addf %23, %25 : vector<8x128xf32>
      %c0_14 = arith.constant 0 : index
      %c0_15 = arith.constant 0 : index
      %27 = vector.load %arg3[%c0_14, %c0_15] : memref<8x128xf32, #tpu.memory_space<vmem>>, vector<8x128xf32>
      tpu.vector_store %arg3[%c0_14, %c0_15], %26 {strides = array<i32>} : memref<8x128xf32, #tpu.memory_space<vmem>>, vector<8x128xf32>,
    } else {
    }
    return
  }
  func.func @transform_0(%arg0: i32) -> (i32, i32) {
    %c0_i32 = arith.constant 0 : i32
    %0 = arith.minsi %arg0, %c0_i32 : i32
    %c0_i32_0 = arith.constant 0 : i32
    %c0_i32_1 = arith.constant 0 : i32
    return %0, %c0_i32_0 : i32, i32
  }
  func.func @transform_1(%arg0: i32) -> (i32, i32) {
    %c0_i32 = arith.constant 0 : i32
    %0 = arith.minsi %arg0, %c0_i32 : i32
    %c0_i32_0 = arith.constant 0 : i32
    %c0_i32_1 = arith.constant 0 : i32
    return %0, %c0_i32_0 : i32, i32
  }
  func.func @transform_2(%arg0: i32) -> (i32, i32) {
    %c0_i32 = arith.constant 0 : i32
    %c0_i32_0 = arith.constant 0 : i32
    %c0_i32_1 = arith.constant 0 : i32
    return %c0_i32, %c0_i32_0 : i32, i32
  }
}

</mosaic_0001>

<bundles_post_ra>
// kernel: tpu_custom_call.1
= control target key start
LH: loop header
LB: loop body
LE: loop exit
PB: predicated region body
PF: predicated region fallthrough
CT: control target
= control target key end

     0   :  { %7 = vsyncpa [#allocation3], 0  ;;  %s239_s0 = inlined_call_operand.hbm [shape: f32[16,128], index: 0, kind: input, shape index: {}]   ;;  %s240_s1 = inlined_call_operand.hbm [shape: f32[16,128], index: 1, kind: input, shape index: {}]   ;;  %s241_s2 = inlined_call_operand.hbm [shape: f32[8,128], index: 2, kind: output, shape index: {}]  }
   0x1   :  { %8 = vsyncpa [#allocation6], 0 }
   0x2   :  { %9 = vsyncpa [#allocation4], 0  ;;  %s183_s9 = smov [#allocation2]   ;;  %s111_s13 = scalar_lea.hbm %s239_s0, 256 }
   0x3   :  { %s15_s10 = sshll.u32 %s183_s9, 4  ;;  %p112_p0 = scmp.ne.s32.totalorder %s239_s0, %s111_s13  ;;  %s16_s10 = int_to_ptr.vmem [resolvable:$true] %s15_s10 }
   0x4   :  { %p115_p1 = scmp.lt.u32.totalorder %s111_s13, %s239_s0 }
   0x6   :  { %p117_p2 = pnand %p115_p1, %p112_p0 }
   0x8   :  { %120 = shalt.err (!%p117_p2)
}
   0x9   :  { %s121_s18 = scalar_lea.vmem %s16_s10, 256  ;;  %p126_p4 = scmp.lt.s32.totalorder %s16_s10, %s16_s10 }
   0xa   :  { %p122_p3 = scmp.ne.s32.totalorder %s16_s10, %s121_s18  ;;  %p127_p5 = scmp.lt.s32.totalorder %s121_s18, %s121_s18 }
   0xc   :  { %p128_p6 = por %p127_p5, %p126_p4 }
   0xe   :  { %p129_p7 = pnand %p128_p6, %p122_p3 }
  0x10   :  { %132 = shalt.err (!%p129_p7)
}
  0x11   :  { %s184_s19 = smov 128   ;;  %s185_s20 = smov 8  }
  0x12   :  { %21 = dma.hbm_to_vmem [thread:$0]  %s239_s0, 256, %s16_s10, [#allocation3], %s184_s19, %s184_s19, %s185_s20  }
  0x13   :  { %s186_s23 = smov [#allocation5]   ;;  %s133_s27 = scalar_lea.hbm %s240_s1, 256 }
  0x14   :  { %s27_s24 = sshll.u32 %s186_s23, 4  ;;  %p134_p8 = scmp.ne.s32.totalorder %s240_s1, %s133_s27  ;;  %s28_s24 = int_to_ptr.vmem [resolvable:$true] %s27_s24 }
  0x15   :  { %p137_p9 = scmp.lt.u32.totalorder %s133_s27, %s240_s1 }
  0x17   :  { %p139_p10 = pnand %p137_p9, %p134_p8 }
  0x19   :  { %142 = shalt.err (!%p139_p10)
}
  0x1a   :  { %s143_s4 = scalar_lea.vmem %s28_s24, 256  ;;  %p148_p12 = scmp.lt.s32.totalorder %s28_s24, %s28_s24 }
  0x1b   :  { %p144_p11 = scmp.ne.s32.totalorder %s28_s24, %s143_s4  ;;  %p149_p13 = scmp.lt.s32.totalorder %s143_s4, %s143_s4 }
  0x1d   :  { %p150_p0 = por %p149_p13, %p148_p12 }
  0x1f   :  { %p151_p1 = pnand %p150_p0, %p144_p11 }
  0x21   :  { %154 = shalt.err (!%p151_p1)
}
  0x22   :  { %33 = dma.hbm_to_vmem [thread:$0]  %s240_s1, 256, %s28_s24, [#allocation6], %s184_s19, %s184_s19, %s185_s20  }
  0x23   :  { %177 = dma.done.wait [#allocation3], 256  }
  0x24   :  { %178 = vsyncadd [#allocation3], 4294967040 }
  0x25   :  { %179 = dma.done.wait [#allocation6], 256  }
  0x26   :  { %180 = vsyncadd [#allocation6], 4294967040  ;;  %v51_v0 = vld [vmem:[#allocation2] sm:$0xff]  ;;  %v52_v1 = vld [vmem:[#allocation2 + $0x8] sm:$0xff]  ;;  %s187_s6 = smov [#allocation7]  }
  0x27   :  { %v53_v2 = vld [vmem:[#allocation5] sm:$0xff]  ;;  %v54_v3 = vld [vmem:[#allocation5 + $0x8] sm:$0xff]  ;;  %s95_s7 = sshll.u32 %s187_s6, 4  ;;  %s96_s7 = int_to_ptr.vmem [resolvable:$true] %s95_s7 }
  0x28   :  { %v55_v4 = vsub.f32 %v51_v0, %v53_v2  ;;  %v56_v5 = vsub.f32 %v52_v1, %v54_v3  ;;  %s155_s8 = scalar_lea.vmem %s96_s7, 128  ;;  %p160_p3 = scmp.lt.s32.totalorder %s96_s7, %s96_s7 }
  0x29   :  { %p156_p2 = scmp.ne.s32.totalorder %s96_s7, %s155_s8  ;;  %p161_p4 = scmp.lt.s32.totalorder %s155_s8, %s155_s8 }
  0x2a   :  { %v57_v6 = vmul.f32 %v55_v4, %v55_v4  ;;  %v58_v7 = vmul.f32 %v56_v5, %v56_v5 }
  0x2b   :  { %p162_p5 = por %p161_p4, %p160_p3 }
  0x2c   :  { %v60_v8 = vadd.f32 %v58_v7, %v57_v6 }
  0x2d   :  { %p163_p6 = pnand %p162_p5, %p156_p2 }
  0x2e   :  { %62 = vst [vmem:[#allocation7] sm:$0xff] %v60_v8 }
  0x2f   :  { %166 = shalt.err (!%p163_p6)
}
  0x30   :  { %s167_s10 = scalar_lea.hbm %s241_s2, 128 }
  0x31   :  { %p168_p7 = scmp.ne.s32.totalorder %s241_s2, %s167_s10  ;;  %p171_p8 = scmp.lt.u32.totalorder %s167_s10, %s241_s2 }
  0x33   :  { %p173_p9 = pnand %p171_p8, %p168_p7 }
  0x35   :  { %176 = shalt.err (!%p173_p9)
}
  0x36   :  { %98 = dma.vmem_to_hbm [thread:$0]  %s96_s7, 128, %s241_s2, [#allocation4]  }
  0x37   :  { %181 = dma.done.wait [#allocation4], 128  }
  0x38   :  { %182 = vsyncadd [#allocation4], 4294967168 }
  0x39   :  { %102 = vsyncpa [#allocation3], 1 }
  0x3a   :  { %103 = vsyncpa [#allocation6], 1 }
  0x3b   :  { %104 = vsyncpa [#allocation4], 1 }

</bundles_post_ra>
